<compile_context>
chip_gen: v7x
topology: tpu7x:2x2x1
jax: 0.10.0
libtpu: 0.0.40
codegen_flags: <defaults>
</compile_context>

<pallas_src>
import jax
import jax.numpy as jnp
from jax.experimental import pallas as pl
from jax.experimental.pallas import tpu as pltpu


def _round_up(x: int, m: int) -> int:
    return ((x + m - 1) // m) * m


def _adaptive_pool_matrix(in_size: int, out_size: int) -> jnp.ndarray:
    """Row-stochastic matrix M [out_size, in_size] s.t. M @ x == AdaptiveAvgPool1d(x)."""
    i = jnp.arange(out_size)
    starts = (i * in_size) // out_size
    ends = -((-(i + 1) * in_size) // out_size)  # ceil((i+1)*in/out)
    idx = jnp.arange(in_size)
    mask = (idx[None, :] >= starts[:, None]) & (idx[None, :] < ends[:, None])
    counts = (ends - starts).astype(jnp.float32)
    return mask.astype(jnp.float32) / counts[:, None]


def _ppm_kernel(p_ref, x_ref, w_ref, shift_ref, o_ref, acc_ref):
    # p_ref:     [S*S, THW]   tile of the adaptive-avg-pool operator
    # x_ref:     [THW, Cin]   spatial tile of one batch element (batch dim squeezed)
    # w_ref:     [Cin, Cout]  1x1 conv weight (transposed, BN scale folded in)
    # shift_ref: [1, Cout]    folded BN shift (beta - mean * gamma / sqrt(var + eps))
    # o_ref:     [S*S, Cout]  output for this batch element (batch dim squeezed)
    # acc_ref:   [S*S, Cin]   f32 pooling accumulator (VMEM scratch)
    k = pl.program_id(1)

    @pl.when(k == 0)
    def _():
        acc_ref[...] = jnp.zeros_like(acc_ref)

    # Partial adaptive-avg-pool: [S*S, THW] @ [THW, Cin] -> [S*S, Cin], f32 accum.
    acc_ref[...] += jnp.dot(p_ref[...], x_ref[...],
                            preferred_element_type=jnp.float32)

    @pl.when(k == pl.num_programs(1) - 1)
    def _():
        # 1x1 conv (BN scale pre-folded into w) + BN shift + ReLU.
        y = jnp.dot(acc_ref[...], w_ref[...], preferred_element_type=jnp.float32)
        y = y + shift_ref[...]
        o_ref[...] = jnp.maximum(y, 0.0).astype(o_ref.dtype)


def upernet_pyramid_pooling_block(x_nchw, conv_weight, gamma, beta,
                                  running_mean, running_var, pool_scale,
                                  eps=1e-5, block_hw=512,
                                  compute_dtype=jnp.bfloat16):
    """x_nchw: [B, Cin, H, W] -> [B, Cout, pool_scale, pool_scale] (NCHW, like PyTorch).

    block_hw: spatial tile along the H*W reduction axis (multiple of 128).
      Default 512 keeps per-step VMEM small enough for v7x (64 MiB VMEM);
      on v5e/v6e (128 MiB) this can be raised to 1024-2048 together with
      pltpu.CompilerParams(vmem_limit_bytes=...).
    compute_dtype: dtype X and P are streamed in (bf16 halves HBM traffic;
      accumulation is always f32 on the MXU).
    """
    B, Cin, H, W = x_nchw.shape
    Cout = conv_weight.shape[0]
    S = int(pool_scale)
    hw = H * W

    # --- glue: pick a 128-multiple spatial tile and pad H*W to a multiple of it ---
    blk = min(block_hw, _round_up(hw, 128))
    blk = _round_up(blk, 128)
    hw_pad = _round_up(hw, blk)
    n_k = hw_pad // blk

    # NCHW -> [B, H*W, Cin] channels-last; zero-pad spatial (padded P cols are 0).
    x_flat = jnp.transpose(x_nchw, (0, 2, 3, 1)).reshape(B, hw, Cin)
    if hw_pad != hw:
        x_flat = jnp.pad(x_flat, ((0, 0), (0, hw_pad - hw), (0, 0)))
    x_flat = x_flat.astype(compute_dtype)

    # Adaptive-avg-pool as a [S*S, H*W] operator.
    ph = _adaptive_pool_matrix(H, S)                                     # [S, H]
    pw = _adaptive_pool_matrix(W, S)                                     # [S, W]
    P = (ph[:, None, :, None] * pw[None, :, None, :]).reshape(S * S, hw)
    if hw_pad != hw:
        P = jnp.pad(P, ((0, 0), (0, hw_pad - hw)))
    P = P.astype(compute_dtype)

    # Fold BN (eval-mode) scale into the 1x1 conv weight; keep the shift.
    bn_scale = gamma / jnp.sqrt(running_var + eps)                       # [Cout]
    bn_shift = (beta - running_mean * bn_scale).reshape(1, Cout).astype(jnp.float32)
    w_mat = (conv_weight.reshape(Cout, Cin).T * bn_scale[None, :]).astype(jnp.float32)

    # --- hot path: grid = (batch [parallel], spatial tiles [reduction]) ---
    out_flat = pl.pallas_call(
        _ppm_kernel,
        out_shape=jax.ShapeDtypeStruct((B, S * S, Cout), jnp.float32),
        grid_spec=pltpu.PrefetchScalarGridSpec(
            num_scalar_prefetch=0,
            grid=(B, n_k),
            in_specs=[
                pl.BlockSpec((S * S, blk), lambda b, k: (0, k)),
                pl.BlockSpec((pl.Squeezed(), blk, Cin), lambda b, k: (b, k, 0)),
                pl.BlockSpec((Cin, Cout), lambda b, k: (0, 0)),
                pl.BlockSpec((1, Cout), lambda b, k: (0, 0)),
            ],
            out_specs=pl.BlockSpec((pl.Squeezed(), S * S, Cout),
                                   lambda b, k: (b, 0, 0)),
            scratch_shapes=[pltpu.VMEM((S * S, Cin), jnp.float32)],
        ),
        compiler_params=pltpu.CompilerParams(
            dimension_semantics=("parallel", "arbitrary")),
    )(P, x_flat, w_mat, bn_shift)

    # back to NCHW
    return jnp.transpose(out_flat.reshape(B, S, S, Cout), (0, 3, 1, 2))


def _reference(x_nchw, conv_weight, gamma, beta, running_mean, running_var,
               pool_scale, eps=1e-5):
    """Pure-JAX f32 reference of the same forward pass (for validation)."""
    B, Cin, H, W = x_nchw.shape
    Cout = conv_weight.shape[0]
    S = int(pool_scale)
    ph = _adaptive_pool_matrix(H, S)                       # [S, H]
    pw = _adaptive_pool_matrix(W, S)                       # [S, W]
    pooled = jnp.einsum('ih,bchw->bciw', ph, x_nchw)       # avg over h
    pooled = jnp.einsum('jw,bciw->bcij', pw, pooled)       # avg over w -> [B, Cin, S, S]
    y = jnp.einsum('oc,bcij->boij', conv_weight.reshape(Cout, Cin), pooled)
    scale = (gamma / jnp.sqrt(running_var + eps)).reshape(1, Cout, 1, 1)
    shift = (beta - running_mean * gamma / jnp.sqrt(running_var + eps)).reshape(1, Cout, 1, 1)
    return jnp.maximum(y * scale + shift, 0.0)


if __name__ == "__main__":
    B, Cin, H, W = 2, 4, 16, 16
    Cout = 8

    key = jax.random.PRNGKey(0)
    kx, kw, kg, kb, km, kv = jax.random.split(key, 6)

    x = jax.random.normal(kx, (B, Cin, H, W), dtype=jnp.float32)
    conv_weight = jax.random.normal(kw, (Cout, Cin, 1, 1), dtype=jnp.float32) * 0.1
    gamma = jax.random.uniform(kg, (Cout,), dtype=jnp.float32, minval=0.5, maxval=1.5)
    beta = jax.random.normal(kb, (Cout,), dtype=jnp.float32) * 0.1
    running_mean = jax.random.normal(km, (Cout,), dtype=jnp.float32) * 0.1
    running_var = jax.random.uniform(kv, (Cout,), dtype=jnp.float32, minval=0.5, maxval=1.5)

    # 1) Default (bf16-streamed) path, pool_scale=2, single spatial tile.
    out = upernet_pyramid_pooling_block(x, conv_weight, gamma, beta,
                                        running_mean, running_var, pool_scale=2)
    out = jax.block_until_ready(out)
    ref = _reference(x, conv_weight, gamma, beta, running_mean, running_var, 2)
    assert out.shape == (B, Cout, 2, 2), out.shape
    assert jnp.allclose(out, ref, atol=2e-2, rtol=2e-2), \
        float(jnp.max(jnp.abs(out - ref)))

    # 2) f32 path with a tiled spatial reduction (2 tiles of 128) and uneven
    #    adaptive-pool bins (pool_scale=3) to exercise the accumulator path.
    out3 = upernet_pyramid_pooling_block(x, conv_weight, gamma, beta,
                                         running_mean, running_var, pool_scale=3,
                                         block_hw=128, compute_dtype=jnp.float32)
    out3 = jax.block_until_ready(out3)
    ref3 = _reference(x, conv_weight, gamma, beta, running_mean, running_var, 3)
    assert out3.shape == (B, Cout, 3, 3), out3.shape
    assert jnp.allclose(out3, ref3, atol=5e-3, rtol=5e-3), \
        float(jnp.max(jnp.abs(out3 - ref3)))

    print("KERNEL_OK")
</pallas_src>

<mosaic_0001>
module attributes {stable_mosaic.version = 11 : i64} {
  func.func @_ppm_kernel(%arg0: i32, %arg1: i32, %arg2: memref<4x256xbf16, #tpu.memory_space<vmem>>, %arg3: memref<1x256x4xbf16, #tpu.memory_space<vmem>>, %arg4: memref<4x8xf32, #tpu.memory_space<vmem>>, %arg5: memref<1x8xf32, #tpu.memory_space<vmem>>, %arg6: memref<1x4x8xf32, #tpu.memory_space<vmem>>, %arg7: memref<4x4xf32, #tpu.memory_space<vmem>>) attributes {dimension_semantics = [#tpu.dimension_semantics<parallel>, #tpu.dimension_semantics<arbitrary>], iteration_bounds = array<i64: 2, 1>, scalar_prefetch = 0 : i64, scratch_operands = 1 : i64, tpu.core_type = #tpu.core_type<tc>, window_params = [{transform_indices = @transform_0, window_bounds = array<i64: 4, 256>}, {transform_indices = @transform_1, window_bounds = array<i64: 1, 256, 4>}, {pipeline_mode = #tpu.pipeline_mode<synchronous>, transform_indices = @transform_2, window_bounds = array<i64: 4, 8>}, {pipeline_mode = #tpu.pipeline_mode<synchronous>, transform_indices = @transform_3, window_bounds = array<i64: 1, 8>}, {transform_indices = @transform_4, window_bounds = array<i64: 1, 4, 8>}]} {
    %c0_i32 = arith.constant 0 : i32
    %0 = arith.cmpi eq, %arg1, %c0_i32 : i32
    %1 = arith.extui %0 : i1 to i32
    %c0_i32_0 = arith.constant 0 : i32
    %2 = arith.cmpi ne, %1, %c0_i32_0 : i32
    scf.if %2 {
      %cst_11 = arith.constant 0.000000e+00 : f32
      %13 = vector.broadcast %cst_11 : f32 to vector<4x4xf32>
      %c0_12 = arith.constant 0 : index
      %c0_13 = arith.constant 0 : index
      %14 = vector.load %arg7[%c0_12, %c0_13] : memref<4x4xf32, #tpu.memory_space<vmem>>, vector<4x4xf32>
      tpu.vector_store %arg7[%c0_12, %c0_13], %13 {strides = array<i32>} : memref<4x4xf32, #tpu.memory_space<vmem>>, vector<4x4xf32>,
    } else {
    }
    %c0 = arith.constant 0 : index
    %c0_1 = arith.constant 0 : index
    %3 = vector.load %arg7[%c0, %c0_1] : memref<4x4xf32, #tpu.memory_space<vmem>>, vector<4x4xf32>
    %c0_2 = arith.constant 0 : index
    %c0_3 = arith.constant 0 : index
    %4 = vector.load %arg2[%c0_2, %c0_3] : memref<4x256xbf16, #tpu.memory_space<vmem>>, vector<4x256xbf16>
    %c0_4 = arith.constant 0 : index
    %c0_5 = arith.constant 0 : index
    %c0_6 = arith.constant 0 : index
    %5 = vector.load %arg3[%c0_4, %c0_5, %c0_6] : memref<1x256x4xbf16, #tpu.memory_space<vmem>>, vector<1x256x4xbf16>
    %6 = vector.shape_cast %5 : vector<1x256x4xbf16> to vector<256x4xbf16>
    %cst = arith.constant dense<0.000000e+00> : vector<4x4xf32>
    %7 = tpu.matmul %4, %6, %cst {dimension_numbers = #tpu.dot_dimension_numbers<[1], [0], [0], [1], [0, 0, 1, 1], [], []>} : vector<4x256xbf16>, vector<256x4xbf16>, vector<4x4xf32> -> vector<4x4xf32>
    %8 = arith.addf %3, %7 : vector<4x4xf32>
    %c0_7 = arith.constant 0 : index
    %c0_8 = arith.constant 0 : index
    %9 = vector.load %arg7[%c0_7, %c0_8] : memref<4x4xf32, #tpu.memory_space<vmem>>, vector<4x4xf32>
    tpu.vector_store %arg7[%c0_7, %c0_8], %8 {strides = array<i32>} : memref<4x4xf32, #tpu.memory_space<vmem>>, vector<4x4xf32>,
    %c0_i32_9 = arith.constant 0 : i32
    %10 = arith.cmpi eq, %arg1, %c0_i32_9 : i32
    %11 = arith.extui %10 : i1 to i32
    %c0_i32_10 = arith.constant 0 : i32
    %12 = arith.cmpi ne, %11, %c0_i32_10 : i32
    scf.if %12 {
      %c0_11 = arith.constant 0 : index
      %c0_12 = arith.constant 0 : index
      %13 = vector.load %arg7[%c0_11, %c0_12] : memref<4x4xf32, #tpu.memory_space<vmem>>, vector<4x4xf32>
      %c0_13 = arith.constant 0 : index
      %c0_14 = arith.constant 0 : index
      %14 = vector.load %arg4[%c0_13, %c0_14] : memref<4x8xf32, #tpu.memory_space<vmem>>, vector<4x8xf32>
      %cst_15 = arith.constant dense<0.000000e+00> : vector<4x8xf32>
      %15 = tpu.matmul %13, %14, %cst_15 {dimension_numbers = #tpu.dot_dimension_numbers<[1], [0], [0], [1], [0, 0, 1, 1], [], []>} : vector<4x4xf32>, vector<4x8xf32>, vector<4x8xf32> -> vector<4x8xf32>
      %c0_16 = arith.constant 0 : index
      %c0_17 = arith.constant 0 : index
      %16 = vector.load %arg5[%c0_16, %c0_17] : memref<1x8xf32, #tpu.memory_space<vmem>>, vector<1x8xf32>
      %17 = vector.broadcast %16 : vector<1x8xf32> to vector<4x8xf32>
      %18 = arith.addf %15, %17 : vector<4x8xf32>
      %cst_18 = arith.constant 0.000000e+00 : f32
      %19 = vector.broadcast %cst_18 : f32 to vector<4x8xf32>
      %20 = arith.maximumf %18, %19 : vector<4x8xf32>
      %c0_19 = arith.constant 0 : index
      %c0_20 = arith.constant 0 : index
      %c0_21 = arith.constant 0 : index
      %21 = vector.load %arg6[%c0_19, %c0_20, %c0_21] : memref<1x4x8xf32, #tpu.memory_space<vmem>>, vector<1x4x8xf32>
      %22 = vector.shape_cast %21 : vector<1x4x8xf32> to vector<4x8xf32>
      %23 = vector.shape_cast %20 : vector<4x8xf32> to vector<1x4x8xf32>
      tpu.vector_store %arg6[%c0_19, %c0_20, %c0_21], %23 {strides = array<i32>} : memref<1x4x8xf32, #tpu.memory_space<vmem>>, vector<1x4x8xf32>,
    } else {
    }
    return
  }
  func.func @transform_0(%arg0: i32, %arg1: i32) -> (i32, i32) {
    %c0_i32 = arith.constant 0 : i32
    %c0_i32_0 = arith.constant 0 : i32
    return %c0_i32, %arg1 : i32, i32
  }
  func.func @transform_1(%arg0: i32, %arg1: i32) -> (i32, i32, i32) {
    %c0_i32 = arith.constant 0 : i32
    %c0_i32_0 = arith.constant 0 : i32
    return %arg0, %arg1, %c0_i32 : i32, i32, i32
  }
  func.func @transform_2(%arg0: i32, %arg1: i32) -> (i32, i32) {
    %c0_i32 = arith.constant 0 : i32
    %c0_i32_0 = arith.constant 0 : i32
    %c0_i32_1 = arith.constant 0 : i32
    return %c0_i32, %c0_i32_0 : i32, i32
  }
  func.func @transform_3(%arg0: i32, %arg1: i32) -> (i32, i32) {
    %c0_i32 = arith.constant 0 : i32
    %c0_i32_0 = arith.constant 0 : i32
    %c0_i32_1 = arith.constant 0 : i32
    return %c0_i32, %c0_i32_0 : i32, i32
  }
  func.func @transform_4(%arg0: i32, %arg1: i32) -> (i32, i32, i32) {
    %c0_i32 = arith.constant 0 : i32
    %c0_i32_0 = arith.constant 0 : i32
    %c0_i32_1 = arith.constant 0 : i32
    return %arg0, %c0_i32, %c0_i32_0 : i32, i32, i32
  }
}

</mosaic_0001>

<bundles_post_ra>
// kernel: tpu_custom_call.1
= control target key start
LH: loop header
LB: loop body
LE: loop exit
PB: predicated region body
PF: predicated region fallthrough
CT: control target
= control target key end

     0   :  { %9 = vsyncpa [#allocation4], 0  ;;  %s999_s0 = inlined_call_operand.vmem [shape: bf16[4,256], index: 0, kind: input, shape index: {}]   ;;  %s1000_s1 = inlined_call_operand.vmem [shape: bf16[2,256,4], index: 1, kind: input, shape index: {}]   ;;  %s1001_s2 = inlined_call_operand.vmem [shape: f32[4,8], index: 2, kind: input, shape index: {}]   ;;  %s1002_s3 = inlined_call_operand.vmem [shape: f32[1,8], index: 3, kind: input, shape index: {}]   ;;  %s1003_s4 = inlined_call_operand.hbm [shape: f32[2,4,8], index: 4, kind: output, shape index: {}]  }
   0x1   :  { %11 = vsyncpa [#allocation4 + $0x1], 0  ;;  %s876_s15 = smov 0   ;;  %s878_s16 = smov 0  }
   0x2   :  { %s880_s17 = smov 0   ;;  %s882_s18 = smov 0  }
   0x3   :  { %s884_s19 = smov 0   ;;  %s886_s20 = smov 0  }
   0x4 LB: > { %s632_s21 = sadd.s32 4294967295, %s846_s20   ;;  %s633_s22 = sadd.s32 4294967294, %s846_s20   ;;  %s846_s20 = sphi %s886_s20, %s17_s20   ;;  %s842_s19 = sphi %s884_s19, %s1010_s19   ;;  %s838_s18 = sphi %s882_s18, %s1009_s18   ;;  %s834_s17 = sphi %s880_s17, %s1008_s17   ;;  %s830_s16 = sphi %s878_s16, %s1007_s16   ;;  %s826_s15 = sphi %s876_s15, %s1006_s15  }
   0x5   : > { %s29_s23 = sadd.s32 1, %s842_s19  ;;  %s132_s24 = sadd.s32 1, %s834_s17 }
   0x6   : > { %p31_p0 = scmp.ge.s32.totalorder %s29_s23, 2  ;;  %p142_p1 = scmp.ne.s32.totalorder %s834_s17, %s830_s16 }
   0x7   : > { %p143_p2 = scmp.eq.s32.totalorder %s632_s21, 1  ;;  %p148_p3 = scmp.ne.s32.totalorder %s830_s16, %s826_s15 }
   0x8   : > { %s1012_s23 = smov (%p31_p0, %s29_s23), 0  ;;  %p149_p5 = scmp.eq.s32.totalorder %s633_s22, 1 }
   0x9   : > { %p916_p4 = por %p143_p2, %p142_p1  ;;  %s129_s26 = ssub.s32 %s842_s19, %s1012_s23 }
   0xa   : > { %p637_p6 = scmp.ge.s32.totalorder %s846_s20, 1  ;;  %p130_p7 = scmp.eq.s32.totalorder %s129_s26, 0 }
   0xb   : > { %p923_p8 = por %p149_p5, %p148_p3  ;;  %p195_p9 = scmp.lt.s32.totalorder %s846_s20, 3 }
   0xc   : > { %s929_s28 = scalar_select %p130_p7, %s834_s17, %s132_s24  }
   0xd   : > { %p196_p10 = pnand %p637_p6, %p195_p9 }
   0xe   : > { %p237_p11 = scmp.lt.s32.totalorder (!%p196_p10), %s838_s18, 1  ;;  %v641_v0 = vld.sshfl [vmem:[%s999_s0] sm:$0x33 pattern:$0x76325410] (!%p196_p10)  ;;  %vm251_vm0 = vcmask (!%p196_p10), 27648  }
   0xf   : > { %199 = sbr.rel (%p196_p10) target bundleno = 514 (0x202), region = 36  ;;  %v295_v1 = vcombine.high (!%p196_p10), %v641_v0, %v641_v0  ;;  %v848_v18 = vmov (!%p196_p10), 0.0   ;;  %v441_v19 = vld [vmem:[%s1001_s2] sm:$0xf] (!%p196_p10)  ;;  %vm453_vm1 = vcmask (!%p196_p10), 1043456   ;;  %vm849_vm2 = vmmov (!%p196_p10), 0  }
  0x10   : > { %252 = vst.msk [vmem:[#allocation2] sm:$0xf] (!%p196_p10), %vm251_vm0, %v848_v18  ;;  %690 = vmatprep.subr.mxu1 (!%p196_p10), %v848_v18  ;;  %692 = vmatprep.mubr.msk.f32.mxu1 (!%p196_p10), %vm849_vm2, %v848_v18  ;;  %vm449_vm3 = vcmask (!%p196_p10), 31744   ;;  %s227_s12 = sand.u32 (!%p196_p10), 1, %s830_s16   ;;  %v658_v28 = vld [vmem:[%s1002_s3] ss:$0 sm:$0xff] (!%p196_p10) }
  0x11   : > { %426 = vmatprep.mubr.bf16.mxu0 (!%p196_p10), %v295_v1  ;;  %691 = vmatpush3.msk.msra.mxu1 (!%p196_p10), %vm453_vm1, %v441_v19  ;;  %s638_s13 = sshll.u32 (!%p196_p10), %s227_s12, 2  ;;  %s662_s22 = sshll.u32 (!%p196_p10), %s838_s18, 6  ;;  %vm528_vm4 = vcmask (!%p196_p10), 60416  }
  0x12   : > { %s229_s24 = scalar_lea.vmem (!%p196_p10), [#allocation3], %s638_s13 }
  0x13   : > { %s544_s26 = sshll.u32 (!%p196_p10), %s229_s24, 4  ;;  %s954_s26 = int_to_ptr.vmem [resolvable:$true] %s544_s26 }
  0x14   : > { %s768_s7 = scalar_lea.vmem (!%p196_p10), %s954_s26, 64 }
  0x15   : > { %p769_p12 = scmp.ne.s32.totalorder (!%p196_p10), %s954_s26, %s768_s7 }
  0x16   : > { %s238_s5 = scalar_select %p237_p11, %s838_s18, 1 }
  0x17   : > { %v253_v22 = vld [vmem:[#allocation2] sm:$0xf]  ;;  %p770_p13 = pnand %p769_p12, %p916_p4  ;;  %s850_s18 = smov [#allocation3]  }
  0x18   : > { %s665_s6 = sshll.u32 %s238_s5, 7  ;;  %s952_s5 = scalar_lea.hbm %s1003_s4, %s662_s22 }
  0x19   : > { %s244_s9 = scalar_lea.vmem %s1000_s1, %s665_s6  ;;  %s531_s6 = scalar_lea.sflag [#allocation4], %s227_s12 }
  0x1a   : > { %v752_v2 = vld [vmem:[%s244_s9 + $0x40] sm:$0xff]   ;;  %v754_v4 = vld [vmem:[%s244_s9 + $0x48] sm:$0xff]   ;;  %v756_v6 = vld [vmem:[%s244_s9 + $0x50] sm:$0xff]   ;;  %p771_p0 = pneg %p770_p13  ;;  %s772_s8 = sshll.u32 %s850_s18, 4  ;;  %s773_s8 = int_to_ptr.vmem [resolvable:$false] %s772_s8 }
  0x1b   : > { %v753_v3 = vld [vmem:[%s244_s9] sm:$0xff]   ;;  %666 = vmatprep.subr.bf16.mxu0 %v752_v2  ;;  %v755_v5 = vld [vmem:[%s244_s9 + $0x8] sm:$0xff]   ;;  %v757_v7 = vld [vmem:[%s244_s9 + $0x10] sm:$0xff]   ;;  %p775_p1 = scmp.lt.s32.totalorder %s954_s26, %s773_s8 }
  0x1c   : > { %667 = vmatpush3.bf16.msra.mxu0 %v753_v3  ;;  %v758_v8 = vld [vmem:[%s244_s9 + $0x58] sm:$0xff]   ;;  %v760_v10 = vld [vmem:[%s244_s9 + $0x60] sm:$0xff]   ;;  %v762_v12 = vld [vmem:[%s244_s9 + $0x68] sm:$0xff]  }
  0x1d   : > { %668 = vmatprep.subr.bf16.mxu0 %v754_v4  ;;  %v759_v9 = vld [vmem:[%s244_s9 + $0x18] sm:$0xff]   ;;  %v761_v11 = vld [vmem:[%s244_s9 + $0x20] sm:$0xff]   ;;  %v763_v13 = vld [vmem:[%s244_s9 + $0x28] sm:$0xff]  }
  0x1e   : > { %v764_v14 = vld [vmem:[%s244_s9 + $0x70] sm:$0xff]   ;;  %v766_v16 = vld [vmem:[%s244_s9 + $0x78] sm:$0xff]  }
  0x1f   : > { %v765_v15 = vld [vmem:[%s244_s9 + $0x30] sm:$0xff]   ;;  %v767_v17 = vld [vmem:[%s244_s9 + $0x38] sm:$0xff]   ;;  %s774_s9 = scalar_lea.vmem %s773_s8, 128 }
  0x20   : > { %669 = vmatpush3.bf16.msra.mxu0 %v755_v5  ;;  %p776_p2 = scmp.lt.s32.totalorder %s774_s9, %s768_s7 }
  0x21   : > { %670 = vmatprep.subr.bf16.mxu0 %v756_v6 }
  0x22   : > { %p777_p3 = por %p776_p2, %p775_p1 }
  0x24   : > { %671 = vmatpush3.bf16.msra.mxu0 %v757_v7  ;;  %p778_p5 = pnand %p777_p3, %p771_p0 }
  0x25   : > { %672 = vmatprep.subr.bf16.mxu0 %v758_v8 }
  0x28   : > { %673 = vmatpush3.bf16.msra.mxu0 %v759_v9 }
  0x29   : > { %674 = vmatprep.subr.bf16.mxu0 %v760_v10 }
  0x2c   : > { %675 = vmatpush3.bf16.msra.mxu0 %v761_v11 }
  0x2d   : > { %676 = vmatprep.subr.bf16.mxu0 %v762_v12 }
  0x30   : > { %677 = vmatpush3.bf16.msra.mxu0 %v763_v13 }
  0x31   : > { %678 = vmatprep.subr.bf16.mxu0 %v764_v14 }
  0x34   : > { %679 = vmatpush3.bf16.msra.mxu0 %v765_v15 }
  0x35   : > { %680 = vmatprep.subr.bf16.mxu0 %v766_v16 }
  0x38   : > { %681 = vmatpush3.bf16.msra.mxu0 %v767_v17 }
  0x3b   : > { %427 = vmatmul.mubr.bf16.vlgmr.msra.gmra.mrb[0].mxu0 %v641_v0 }
 0x10e   : > { %v682_v20 = vpop.f32.mrb[0].mxu0 }
 0x10f   : > { %v683_v21 = vpop.f32.mrb[1].mxu0 }
 0x110   : > { %v684_v23 = vadd.f32 %v683_v21, %v682_v20  ;;  %v685_v24 = vpop.f32.mrb[2].mxu0 }
 0x111   : > { %v686_v25 = vpop.f32.mrb[3].mxu0 }
 0x112   : > { %v434_v26 = vadd.f32 %v684_v23, %v253_v22 }
 0x114   : > { %436 = vst.msk [vmem:[#allocation2] sm:$0xf] %vm251_vm0, %v434_v26 }
 0x11b   : > { %v440_v27 = vld [vmem:[#allocation2] sm:$0xf] }
 0x11c   : > { %693 = vmatmul.mubr.msk.f32.vlgmr.msra.gmra.mrb[0].mxu1 %vm449_vm3, %v440_v27 }
 0x1ef   : > { %v523_v29 = vpop.f32.mrb[0].mxu1 }
 0x1f0   : > { %v524_v30 = vadd.f32 %v658_v28, %v523_v29  ;;  %v694_v31 = vpop.f32.mrb[1].mxu1 }
 0x1f2   : > { %v527_v32 = vmax.f32 %v524_v30, 0.0 }
 0x1f4   : > { %529 = vst.msk [vmem:[%s229_s24] sm:$0xf] %vm528_vm4, %v527_v32 }
 0x1f5   : > { %781 = shalt.err (!%p778_p5)
}
 0x1f6   : > { %s782_s10 = scalar_lea.hbm %s952_s5, 64  ;;  %s786_s13 = scalar_lea.hbm %s1003_s4, 128 }
 0x1f7   : > { %p783_p6 = scmp.ne.s32.totalorder %s952_s5, %s782_s10  ;;  %p787_p10 = scmp.lt.u32.totalorder %s952_s5, %s1003_s4 }
 0x1f8   : > { %p788_p11 = scmp.lt.u32.totalorder %s786_s13, %s782_s10  ;;  %p790_p13 = scmp.lt.u32.totalorder %s782_s10, %s952_s5 }
 0x1f9   : > { %p784_p7 = pnand %p783_p6, %p916_p4 }
 0x1fa   : > { %p789_p12 = por %p788_p11, %p787_p10 }
 0x1fb   : > { %p785_p9 = pneg %p784_p7 }
 0x1fc   : > { %p791_p0 = por %p790_p13, %p789_p12 }
 0x1fe   : > { %p792_p1 = pnand %p791_p0, %p785_p9 }
 0x200   : > { %795 = shalt.err (!%p792_p1)
}
 0x201   : > { %695 = dma.vmem_to_hbm [thread:$0]  (%p916_p4), %s954_s26, 64, %s952_s5, %s531_s6  }
 0x202 PF: > { %p701_p2 = scmp.ge.s32.totalorder %s846_s20, 2  ;;  %s556_s22 = sand.u32 1, %s826_s15  }
 0x203   : > { %s557_s24 = scalar_lea.sflag [#allocation4], %s556_s22 }
 0x204   : > { %p698_p3 = pnand %p701_p2, %p923_p8 }
 0x206   : > { %821 = dma.done.wait (!%p698_p3), %s557_s24, 64  }
 0x207   : > { %823 = vsyncadd (!%p698_p3), %s557_s24, 4294967232  ;;  %s17_s20 = sadd.s32 1, %s846_s20   ;;  %s1006_s15 = smov %s830_s16 }
 0x208   : > { %p14_p5 = scmp.ge.s32.totalorder %s17_s20, 4   ;;  %s1007_s16 = smov %s834_s17 }
 0x209   : > { %s1008_s17 = smov %s929_s28  ;;  %s1009_s18 = smov %s842_s19 }
 0x20a   : > { %s1010_s19 = smov %s1012_s23  ;;  %16 = sbr.rel (!%p14_p5) target bundleno = 4 (0x4), region = 82 }
 0x211   :  { %562 = vsyncpa [#allocation4], 1 }
 0x212   :  { %564 = vsyncpa [#allocation4 + $0x1], 1 }

</bundles_post_ra>
